<compile_context>
chip_gen: v5e
topology: v5e:2x2
jax: 0.10.0
libtpu: 0.0.40
codegen_flags: <defaults>
</compile_context>

<pallas_src>
import functools

import jax
import jax.numpy as jnp
from jax.experimental import pallas as pl
from jax.experimental.pallas import tpu as pltpu


def enm_attn_classifier_kernel(
    seq_ref, enm_ref,
    w_emb_ref, b_emb_ref,        # (1, E), (1, E)
    w_in_ref, b_in_ref,          # (E, 3E), (1, 3E)
    w_out_ref, b_out_ref,        # (E, E)  [already transposed], (1, E)
    ln_g_ref, ln_b_ref,          # (1, E), (1, E)
    w_adapt_ref, b_adapt_ref,    # (E, D_seq) [transposed], (1, D_seq)
    w_cls_seq_ref, w_cls_enm_ref, b_cls_ref,   # (D_seq, out), (D_seq, out), (1, out)
    out_ref,
    *, num_heads):
    bb, L, d_seq = seq_ref.shape
    E = w_emb_ref.shape[1]
    head_dim = E // num_heads
    scale = 1.0 / (head_dim ** 0.5)
    n = bb * L                                   # token rows in this block

    seq = seq_ref[...].reshape(n, d_seq)         # (n, D_seq)
    enm = enm_ref[...].reshape(n, 1)             # (n, 1)

    # --- embedding: nn.Linear(1, E) on the scalar ENM value ---
    x = enm * w_emb_ref[...] + b_emb_ref[...]    # (n, E)

    # --- fused QKV in-projection: one matmul with N = 3E ---
    qkv = jnp.dot(x, w_in_ref[...],
                  preferred_element_type=jnp.float32) + b_in_ref[...]   # (n, 3E)
    q_all = qkv[:, 0:E] * scale                  # fold 1/sqrt(hd) into q

    # --- per-head attention, batched over the block_b axis.
    # Head outputs are folded directly into the (per-head slice of the)
    # output projection and accumulated, so no lane-wise concat is needed
    # and only one head's score matrix is live at a time.
    w_out = w_out_ref[...]                       # (E, E), rows indexed by head
    att = jnp.zeros((n, E), jnp.float32)
    for h in range(num_heads):
        lo = h * head_dim
        qh = q_all[:, lo:lo + head_dim].reshape(bb, L, head_dim)
        kh = qkv[:, E + lo:E + lo + head_dim].reshape(bb, L, head_dim)
        vh = qkv[:, 2 * E + lo:2 * E + lo + head_dim].reshape(bb, L, head_dim)

        s = jnp.einsum("bqd,bkd->bqk", qh, kh,
                       preferred_element_type=jnp.float32)              # (bb, L, L)
        s = s - jnp.max(s, axis=-1, keepdims=True)
        p = jnp.exp(s)
        p = p * pl.reciprocal(jnp.sum(p, axis=-1, keepdims=True), approx=True)
        oh = jnp.einsum("bqk,bkd->bqd", p, vh,
                        preferred_element_type=jnp.float32)             # (bb, L, hd)

        att = att + jnp.dot(oh.reshape(n, head_dim),
                            w_out[lo:lo + head_dim, :],
                            preferred_element_type=jnp.float32)         # (n, E)

    # --- residual (enm value broadcast over E) + LayerNorm (eps=1e-5) ---
    y = att + b_out_ref[...] + enm
    mean = jnp.mean(y, axis=-1, keepdims=True)
    var = jnp.mean((y - mean) ** 2, axis=-1, keepdims=True)
    y = (y - mean) * jax.lax.rsqrt(var + 1e-5)
    y = y * ln_g_ref[...] + ln_b_ref[...]

    # --- adaptor: Linear(E, D_seq) ---
    enm_embedding = jnp.dot(y, w_adapt_ref[...],
                            preferred_element_type=jnp.float32) + b_adapt_ref[...]

    # --- concat(seq, enm_embedding) + classifier Linear(2*D_seq, out_dim),
    #     implemented as a pre-split-weight sum (no materialized concat) ---
    logits = (jnp.dot(seq, w_cls_seq_ref[...],
                      preferred_element_type=jnp.float32)
              + jnp.dot(enm_embedding, w_cls_enm_ref[...],
                        preferred_element_type=jnp.float32)
              + b_cls_ref[...])                                          # (n, out)

    # One lane-contiguous store for the whole block.
    out_ref[...] = logits.reshape(bb, L, -1).astype(out_ref.dtype)


def enm_adapted_attention_classifier(seq_embedding, enm_input, params,
                                     *, num_heads, block_b=None):
    B, L, d_seq = seq_embedding.shape
    out_dim = params["w_cls"].shape[0]
    enm3 = enm_input.reshape(B, L, 1)

    # Pre-transpose / pre-split weights once in the wrapper (cheap one-off XLA
    # ops) so the kernel never relayouts weights per grid step.
    w_emb_t = params["w_emb"].T                  # (1, E)
    w_in_t = params["w_in"].T                    # (E, 3E)
    w_out_t = params["w_out"].T                  # (E, E)
    w_adapt_t = params["w_adapt"].T              # (E, D_seq)
    w_cls_seq_t = params["w_cls"][:, 0:d_seq].T  # (D_seq, out_dim)
    w_cls_enm_t = params["w_cls"][:, d_seq:].T   # (D_seq, out_dim)

    weights = [
        w_emb_t, params["b_emb"],
        w_in_t, params["b_in"],
        w_out_t, params["b_out"],
        params["ln_g"], params["ln_b"],
        w_adapt_t, params["b_adapt"],
        w_cls_seq_t, w_cls_enm_t, params["b_cls"],
    ]

    # Choose the batch block: aim for >= ~1024 token rows per grid step so the
    # token-wise matmuls fill the MXU and the per-step pipeline overhead is
    # amortized; cap at B and snap to a divisor of B (no partial blocks).
    if block_b is None:
        target_rows = 1024
        block_b = max(1, target_rows // max(L, 1))
    block_b = max(1, min(block_b, B))
    while B % block_b:
        block_b -= 1
    grid = (B // block_b,)

    def full_spec(a):
        return pl.BlockSpec(a.shape, lambda b, _nd=a.ndim: (0,) * _nd)

    in_specs = [
        pl.BlockSpec((block_b, L, d_seq), lambda b: (b, 0, 0)),
        pl.BlockSpec((block_b, L, 1), lambda b: (b, 0, 0)),
    ] + [full_spec(w) for w in weights]

    kernel = functools.partial(enm_attn_classifier_kernel, num_heads=num_heads)

    return pl.pallas_call(
        kernel,
        out_shape=jax.ShapeDtypeStruct((B, L, out_dim), seq_embedding.dtype),
        grid=grid,
        in_specs=in_specs,
        out_specs=pl.BlockSpec((block_b, L, out_dim), lambda b: (b, 0, 0)),
        compiler_params=pltpu.CompilerParams(
            dimension_semantics=("parallel",)),   # batch axis is independent
    )(seq_embedding, enm3, *weights)


def reference_forward(seq_embedding, enm_input, p, num_heads):
    """Pure-JAX reference mirroring the PyTorch forward (for validation)."""
    B, L, d_seq = seq_embedding.shape
    E = p["w_emb"].shape[0]
    hd = E // num_heads
    x = enm_input[..., None] * p["w_emb"][:, 0][None, None, :] + p["b_emb"][0]
    wq, wk, wv = jnp.split(p["w_in"], 3, axis=0)
    bq, bk, bv = jnp.split(p["b_in"][0], 3)
    q = (x @ wq.T + bq).reshape(B, L, num_heads, hd).transpose(0, 2, 1, 3)
    k = (x @ wk.T + bk).reshape(B, L, num_heads, hd).transpose(0, 2, 1, 3)
    v = (x @ wv.T + bv).reshape(B, L, num_heads, hd).transpose(0, 2, 1, 3)
    s = jnp.einsum("bhqd,bhkd->bhqk", q, k) / jnp.sqrt(hd).astype(jnp.float32)
    a = jax.nn.softmax(s, axis=-1)
    o = jnp.einsum("bhqk,bhkd->bhqd", a, v).transpose(0, 2, 1, 3).reshape(B, L, E)
    att = o @ p["w_out"].T + p["b_out"][0]
    y = att + enm_input[..., None]
    mean = y.mean(-1, keepdims=True)
    var = ((y - mean) ** 2).mean(-1, keepdims=True)
    y = (y - mean) / jnp.sqrt(var + 1e-5) * p["ln_g"][0] + p["ln_b"][0]
    enm_emb = y @ p["w_adapt"].T + p["b_adapt"][0]
    comb = jnp.concatenate([seq_embedding, enm_emb], axis=-1)
    return comb @ p["w_cls"].T + p["b_cls"][0]


if __name__ == "__main__":
    # Small, forward-consistent shapes.
    B, L = 2, 8                  # batch, ENM/sequence length
    SEQ_DIM = 32                 # seq_embedding_dim
    OUT_DIM = 4                  # out_dim
    ENM_DIM = 16                 # enm_embed_dim
    NUM_HEADS = 2                # num_att_heads

    key = jax.random.PRNGKey(0)
    keys = jax.random.split(key, 16)

    params = {
        "w_emb":   0.1 * jax.random.normal(keys[0], (ENM_DIM, 1), jnp.float32),
        "b_emb":   0.1 * jax.random.normal(keys[1], (1, ENM_DIM), jnp.float32),
        "w_in":    0.1 * jax.random.normal(keys[2], (3 * ENM_DIM, ENM_DIM), jnp.float32),
        "b_in":    0.1 * jax.random.normal(keys[3], (1, 3 * ENM_DIM), jnp.float32),
        "w_out":   0.1 * jax.random.normal(keys[4], (ENM_DIM, ENM_DIM), jnp.float32),
        "b_out":   0.1 * jax.random.normal(keys[5], (1, ENM_DIM), jnp.float32),
        "ln_g":    jnp.ones((1, ENM_DIM), jnp.float32),
        "ln_b":    jnp.zeros((1, ENM_DIM), jnp.float32),
        "w_adapt": 0.1 * jax.random.normal(keys[6], (SEQ_DIM, ENM_DIM), jnp.float32),
        "b_adapt": 0.1 * jax.random.normal(keys[7], (1, SEQ_DIM), jnp.float32),
        "w_cls":   0.1 * jax.random.normal(keys[8], (OUT_DIM, 2 * SEQ_DIM), jnp.float32),
        "b_cls":   0.1 * jax.random.normal(keys[9], (1, OUT_DIM), jnp.float32),
    }

    seq_embedding = jax.random.normal(keys[10], (B, L, SEQ_DIM), jnp.float32)
    enm_input = jax.random.normal(keys[11], (B, L), jnp.float32)

    logits = enm_adapted_attention_classifier(
        seq_embedding, enm_input, params, num_heads=NUM_HEADS)
    logits = jax.block_until_ready(logits)

    ref = reference_forward(seq_embedding, enm_input, params, NUM_HEADS)
    assert logits.shape == (B, L, OUT_DIM)
    # Tolerance is looser than the previous f32-exact version because the
    # softmax denominator now uses the EUP approximate reciprocal.
    assert jnp.allclose(logits, ref, atol=1e-2, rtol=1e-2), (
        f"max abs err {jnp.max(jnp.abs(logits - ref))}")

    print("KERNEL_OK")
</pallas_src>

<mosaic_0001>
module attributes {stable_mosaic.version = 11 : i64} {
  func.func @enm_attn_classifier_kernel(%arg0: i32, %arg1: memref<2x8x32xf32, #tpu.memory_space<vmem>>, %arg2: memref<2x8x1xf32, #tpu.memory_space<vmem>>, %arg3: memref<1x16xf32, #tpu.memory_space<vmem>>, %arg4: memref<1x16xf32, #tpu.memory_space<vmem>>, %arg5: memref<16x48xf32, #tpu.memory_space<vmem>>, %arg6: memref<1x48xf32, #tpu.memory_space<vmem>>, %arg7: memref<16x16xf32, #tpu.memory_space<vmem>>, %arg8: memref<1x16xf32, #tpu.memory_space<vmem>>, %arg9: memref<1x16xf32, #tpu.memory_space<vmem>>, %arg10: memref<1x16xf32, #tpu.memory_space<vmem>>, %arg11: memref<16x32xf32, #tpu.memory_space<vmem>>, %arg12: memref<1x32xf32, #tpu.memory_space<vmem>>, %arg13: memref<32x4xf32, #tpu.memory_space<vmem>>, %arg14: memref<32x4xf32, #tpu.memory_space<vmem>>, %arg15: memref<1x4xf32, #tpu.memory_space<vmem>>, %arg16: memref<2x8x4xf32, #tpu.memory_space<vmem>>) attributes {dimension_semantics = [#tpu.dimension_semantics<parallel>], iteration_bounds = array<i64: 1>, scalar_prefetch = 0 : i64, scratch_operands = 0 : i64, tpu.core_type = #tpu.core_type<tc>, window_params = [{transform_indices = @transform_0, window_bounds = array<i64: 2, 8, 32>}, {transform_indices = @transform_1, window_bounds = array<i64: 2, 8, 1>}, {pipeline_mode = #tpu.pipeline_mode<synchronous>, transform_indices = @transform_2, window_bounds = array<i64: 1, 16>}, {pipeline_mode = #tpu.pipeline_mode<synchronous>, transform_indices = @transform_3, window_bounds = array<i64: 1, 16>}, {pipeline_mode = #tpu.pipeline_mode<synchronous>, transform_indices = @transform_4, window_bounds = array<i64: 16, 48>}, {pipeline_mode = #tpu.pipeline_mode<synchronous>, transform_indices = @transform_5, window_bounds = array<i64: 1, 48>}, {pipeline_mode = #tpu.pipeline_mode<synchronous>, transform_indices = @transform_6, window_bounds = array<i64: 16, 16>}, {pipeline_mode = #tpu.pipeline_mode<synchronous>, transform_indices = @transform_7, window_bounds = array<i64: 1, 16>}, {pipeline_mode = #tpu.pipeline_mode<synchronous>, transform_indices = @transform_8, window_bounds = array<i64: 1, 16>}, {pipeline_mode = #tpu.pipeline_mode<synchronous>, transform_indices = @transform_9, window_bounds = array<i64: 1, 16>}, {pipeline_mode = #tpu.pipeline_mode<synchronous>, transform_indices = @transform_10, window_bounds = array<i64: 16, 32>}, {pipeline_mode = #tpu.pipeline_mode<synchronous>, transform_indices = @transform_11, window_bounds = array<i64: 1, 32>}, {pipeline_mode = #tpu.pipeline_mode<synchronous>, transform_indices = @transform_12, window_bounds = array<i64: 32, 4>}, {pipeline_mode = #tpu.pipeline_mode<synchronous>, transform_indices = @transform_13, window_bounds = array<i64: 32, 4>}, {pipeline_mode = #tpu.pipeline_mode<synchronous>, transform_indices = @transform_14, window_bounds = array<i64: 1, 4>}, {transform_indices = @transform_15, window_bounds = array<i64: 2, 8, 4>}]} {
    %c0 = arith.constant 0 : index
    %c0_0 = arith.constant 0 : index
    %c0_1 = arith.constant 0 : index
    %0 = vector.load %arg1[%c0, %c0_0, %c0_1] : memref<2x8x32xf32, #tpu.memory_space<vmem>>, vector<2x8x32xf32>
    %1 = vector.shape_cast %0 : vector<2x8x32xf32> to vector<16x32xf32>
    %c0_2 = arith.constant 0 : index
    %c0_3 = arith.constant 0 : index
    %c0_4 = arith.constant 0 : index
    %2 = vector.load %arg2[%c0_2, %c0_3, %c0_4] : memref<2x8x1xf32, #tpu.memory_space<vmem>>, vector<2x8x1xf32>
    %3 = vector.shape_cast %2 : vector<2x8x1xf32> to vector<16x1xf32>
    %c0_5 = arith.constant 0 : index
    %c0_6 = arith.constant 0 : index
    %4 = vector.load %arg3[%c0_5, %c0_6] : memref<1x16xf32, #tpu.memory_space<vmem>>, vector<1x16xf32>
    %5 = vector.broadcast %3 : vector<16x1xf32> to vector<16x16xf32>
    %6 = vector.broadcast %4 : vector<1x16xf32> to vector<16x16xf32>
    %7 = arith.mulf %5, %6 : vector<16x16xf32>
    %c0_7 = arith.constant 0 : index
    %c0_8 = arith.constant 0 : index
    %8 = vector.load %arg4[%c0_7, %c0_8] : memref<1x16xf32, #tpu.memory_space<vmem>>, vector<1x16xf32>
    %9 = vector.broadcast %8 : vector<1x16xf32> to vector<16x16xf32>
    %10 = arith.addf %7, %9 : vector<16x16xf32>
    %c0_9 = arith.constant 0 : index
    %c0_10 = arith.constant 0 : index
    %11 = vector.load %arg5[%c0_9, %c0_10] : memref<16x48xf32, #tpu.memory_space<vmem>>, vector<16x48xf32>
    %cst = arith.constant dense<0.000000e+00> : vector<16x48xf32>
    %12 = tpu.matmul %10, %11, %cst {dimension_numbers = #tpu.dot_dimension_numbers<[1], [0], [0], [1], [0, 0, 1, 1], [], []>} : vector<16x16xf32>, vector<16x48xf32>, vector<16x48xf32> -> vector<16x48xf32>
    %c0_11 = arith.constant 0 : index
    %c0_12 = arith.constant 0 : index
    %13 = vector.load %arg6[%c0_11, %c0_12] : memref<1x48xf32, #tpu.memory_space<vmem>>, vector<1x48xf32>
    %14 = vector.broadcast %13 : vector<1x48xf32> to vector<16x48xf32>
    %15 = arith.addf %12, %14 : vector<16x48xf32>
    %16 = vector.extract_strided_slice %15 {offsets = [0, 0], sizes = [16, 16], strides = [1, 1]} : vector<16x48xf32> to vector<16x16xf32>
    %cst_13 = arith.constant 0.353553385 : f32
    %17 = vector.broadcast %cst_13 : f32 to vector<16x16xf32>
    %18 = arith.mulf %16, %17 : vector<16x16xf32>
    %c0_14 = arith.constant 0 : index
    %c0_15 = arith.constant 0 : index
    %19 = vector.load %arg7[%c0_14, %c0_15] : memref<16x16xf32, #tpu.memory_space<vmem>>, vector<16x16xf32>
    %cst_16 = arith.constant 0.000000e+00 : f32
    %20 = vector.broadcast %cst_16 : f32 to vector<16x16xf32>
    %21 = vector.extract_strided_slice %18 {offsets = [0, 0], sizes = [16, 8], strides = [1, 1]} : vector<16x16xf32> to vector<16x8xf32>
    %22 = vector.shape_cast %21 : vector<16x8xf32> to vector<2x8x8xf32>
    %23 = vector.extract_strided_slice %15 {offsets = [0, 16], sizes = [16, 8], strides = [1, 1]} : vector<16x48xf32> to vector<16x8xf32>
    %24 = vector.shape_cast %23 : vector<16x8xf32> to vector<2x8x8xf32>
    %25 = vector.extract_strided_slice %15 {offsets = [0, 32], sizes = [16, 8], strides = [1, 1]} : vector<16x48xf32> to vector<16x8xf32>
    %26 = vector.shape_cast %25 : vector<16x8xf32> to vector<2x8x8xf32>
    "tpu.trace_start"() <{level = 10 : i32, message = "bqd,bkd->bqk"}> : () -> ()
    %cst_17 = arith.constant dense<0.000000e+00> : vector<2x8x8xf32>
    %27 = tpu.matmul %22, %24, %cst_17 {dimension_numbers = #tpu.dot_dimension_numbers<[2], [2], [1], [1], [0, 0, 0, 1, 1, 1], [0], [0]>} : vector<2x8x8xf32>, vector<2x8x8xf32>, vector<2x8x8xf32> -> vector<2x8x8xf32>
    "tpu.trace_stop"() : () -> ()
    %cst_18 = arith.constant dense<0xFF800000> : vector<2x8xf32>
    %28 = vector.multi_reduction <maximumf>, %27, %cst_18 [2] : vector<2x8x8xf32> to vector<2x8xf32>
    %29 = vector.shape_cast %28 : vector<2x8xf32> to vector<2x8x1xf32>
    %30 = vector.broadcast %29 : vector<2x8x1xf32> to vector<2x8x8xf32>
    %31 = arith.subf %27, %30 : vector<2x8x8xf32>
    %32 = math.exp %31 : vector<2x8x8xf32>
    %cst_19 = arith.constant dense<0.000000e+00> : vector<2x8xf32>
    %33 = vector.multi_reduction <add>, %32, %cst_19 [2] : vector<2x8x8xf32> to vector<2x8xf32>
    %34 = vector.shape_cast %33 : vector<2x8xf32> to vector<2x8x1xf32>
    %35 = tpu.reciprocal %34 {approx = true} : vector<2x8x1xf32> -> vector<2x8x1xf32>
    %36 = vector.broadcast %35 : vector<2x8x1xf32> to vector<2x8x8xf32>
    %37 = arith.mulf %32, %36 : vector<2x8x8xf32>
    "tpu.trace_start"() <{level = 10 : i32, message = "bqk,bkd->bqd"}> : () -> ()
    %cst_20 = arith.constant dense<0.000000e+00> : vector<2x8x8xf32>
    %38 = tpu.matmul %37, %26, %cst_20 {dimension_numbers = #tpu.dot_dimension_numbers<[2], [1], [1], [2], [0, 0, 0, 1, 1, 2], [0], [0]>} : vector<2x8x8xf32>, vector<2x8x8xf32>, vector<2x8x8xf32> -> vector<2x8x8xf32>
    "tpu.trace_stop"() : () -> ()
    %39 = vector.shape_cast %38 : vector<2x8x8xf32> to vector<16x8xf32>
    %40 = vector.extract_strided_slice %19 {offsets = [0, 0], sizes = [8, 16], strides = [1, 1]} : vector<16x16xf32> to vector<8x16xf32>
    %cst_21 = arith.constant dense<0.000000e+00> : vector<16x16xf32>
    %41 = tpu.matmul %39, %40, %cst_21 {dimension_numbers = #tpu.dot_dimension_numbers<[1], [0], [0], [1], [0, 0, 1, 1], [], []>} : vector<16x8xf32>, vector<8x16xf32>, vector<16x16xf32> -> vector<16x16xf32>
    %42 = arith.addf %20, %41 : vector<16x16xf32>
    %43 = vector.extract_strided_slice %18 {offsets = [0, 8], sizes = [16, 8], strides = [1, 1]} : vector<16x16xf32> to vector<16x8xf32>
    %44 = vector.shape_cast %43 : vector<16x8xf32> to vector<2x8x8xf32>
    %45 = vector.extract_strided_slice %15 {offsets = [0, 24], sizes = [16, 8], strides = [1, 1]} : vector<16x48xf32> to vector<16x8xf32>
    %46 = vector.shape_cast %45 : vector<16x8xf32> to vector<2x8x8xf32>
    %47 = vector.extract_strided_slice %15 {offsets = [0, 40], sizes = [16, 8], strides = [1, 1]} : vector<16x48xf32> to vector<16x8xf32>
    %48 = vector.shape_cast %47 : vector<16x8xf32> to vector<2x8x8xf32>
    "tpu.trace_start"() <{level = 10 : i32, message = "bqd,bkd->bqk"}> : () -> ()
    %cst_22 = arith.constant dense<0.000000e+00> : vector<2x8x8xf32>
    %49 = tpu.matmul %44, %46, %cst_22 {dimension_numbers = #tpu.dot_dimension_numbers<[2], [2], [1], [1], [0, 0, 0, 1, 1, 1], [0], [0]>} : vector<2x8x8xf32>, vector<2x8x8xf32>, vector<2x8x8xf32> -> vector<2x8x8xf32>
    "tpu.trace_stop"() : () -> ()
    %cst_23 = arith.constant dense<0xFF800000> : vector<2x8xf32>
    %50 = vector.multi_reduction <maximumf>, %49, %cst_23 [2] : vector<2x8x8xf32> to vector<2x8xf32>
    %51 = vector.shape_cast %50 : vector<2x8xf32> to vector<2x8x1xf32>
    %52 = vector.broadcast %51 : vector<2x8x1xf32> to vector<2x8x8xf32>
    %53 = arith.subf %49, %52 : vector<2x8x8xf32>
    %54 = math.exp %53 : vector<2x8x8xf32>
    %cst_24 = arith.constant dense<0.000000e+00> : vector<2x8xf32>
    %55 = vector.multi_reduction <add>, %54, %cst_24 [2] : vector<2x8x8xf32> to vector<2x8xf32>
    %56 = vector.shape_cast %55 : vector<2x8xf32> to vector<2x8x1xf32>
    %57 = tpu.reciprocal %56 {approx = true} : vector<2x8x1xf32> -> vector<2x8x1xf32>
    %58 = vector.broadcast %57 : vector<2x8x1xf32> to vector<2x8x8xf32>
    %59 = arith.mulf %54, %58 : vector<2x8x8xf32>
    "tpu.trace_start"() <{level = 10 : i32, message = "bqk,bkd->bqd"}> : () -> ()
    %cst_25 = arith.constant dense<0.000000e+00> : vector<2x8x8xf32>
    %60 = tpu.matmul %59, %48, %cst_25 {dimension_numbers = #tpu.dot_dimension_numbers<[2], [1], [1], [2], [0, 0, 0, 1, 1, 2], [0], [0]>} : vector<2x8x8xf32>, vector<2x8x8xf32>, vector<2x8x8xf32> -> vector<2x8x8xf32>
    "tpu.trace_stop"() : () -> ()
    %61 = vector.shape_cast %60 : vector<2x8x8xf32> to vector<16x8xf32>
    %62 = vector.extract_strided_slice %19 {offsets = [8, 0], sizes = [8, 16], strides = [1, 1]} : vector<16x16xf32> to vector<8x16xf32>
    %cst_26 = arith.constant dense<0.000000e+00> : vector<16x16xf32>
    %63 = tpu.matmul %61, %62, %cst_26 {dimension_numbers = #tpu.dot_dimension_numbers<[1], [0], [0], [1], [0, 0, 1, 1], [], []>} : vector<16x8xf32>, vector<8x16xf32>, vector<16x16xf32> -> vector<16x16xf32>
    %64 = arith.addf %42, %63 : vector<16x16xf32>
    %c0_27 = arith.constant 0 : index
    %c0_28 = arith.constant 0 : index
    %65 = vector.load %arg8[%c0_27, %c0_28] : memref<1x16xf32, #tpu.memory_space<vmem>>, vector<1x16xf32>
    %66 = vector.broadcast %65 : vector<1x16xf32> to vector<16x16xf32>
    %67 = arith.addf %64, %66 : vector<16x16xf32>
    %68 = vector.broadcast %3 : vector<16x1xf32> to vector<16x16xf32>
    %69 = arith.addf %67, %68 : vector<16x16xf32>
    %cst_29 = arith.constant dense<0.000000e+00> : vector<16xf32>
    %70 = vector.multi_reduction <add>, %69, %cst_29 [1] : vector<16x16xf32> to vector<16xf32>
    %71 = vector.shape_cast %70 : vector<16xf32> to vector<16x1xf32>
    %cst_30 = arith.constant 1.600000e+01 : f32
    %72 = vector.broadcast %cst_30 : f32 to vector<16x1xf32>
    %73 = arith.divf %71, %72 : vector<16x1xf32>
    %74 = vector.broadcast %73 : vector<16x1xf32> to vector<16x16xf32>
    %75 = arith.subf %69, %74 : vector<16x16xf32>
    %76 = arith.mulf %75, %75 : vector<16x16xf32>
    %cst_31 = arith.constant dense<0.000000e+00> : vector<16xf32>
    %77 = vector.multi_reduction <add>, %76, %cst_31 [1] : vector<16x16xf32> to vector<16xf32>
    %78 = vector.shape_cast %77 : vector<16xf32> to vector<16x1xf32>
    %cst_32 = arith.constant 1.600000e+01 : f32
    %79 = vector.broadcast %cst_32 : f32 to vector<16x1xf32>
    %80 = arith.divf %78, %79 : vector<16x1xf32>
    %81 = vector.broadcast %73 : vector<16x1xf32> to vector<16x16xf32>
    %82 = arith.subf %69, %81 : vector<16x16xf32>
    %cst_33 = arith.constant 9.99999974E-6 : f32
    %83 = vector.broadcast %cst_33 : f32 to vector<16x1xf32>
    %84 = arith.addf %80, %83 : vector<16x1xf32>
    %85 = math.rsqrt %84 : vector<16x1xf32>
    %86 = vector.broadcast %85 : vector<16x1xf32> to vector<16x16xf32>
    %87 = arith.mulf %82, %86 : vector<16x16xf32>
    %c0_34 = arith.constant 0 : index
    %c0_35 = arith.constant 0 : index
    %88 = vector.load %arg9[%c0_34, %c0_35] : memref<1x16xf32, #tpu.memory_space<vmem>>, vector<1x16xf32>
    %89 = vector.broadcast %88 : vector<1x16xf32> to vector<16x16xf32>
    %90 = arith.mulf %87, %89 : vector<16x16xf32>
    %c0_36 = arith.constant 0 : index
    %c0_37 = arith.constant 0 : index
    %91 = vector.load %arg10[%c0_36, %c0_37] : memref<1x16xf32, #tpu.memory_space<vmem>>, vector<1x16xf32>
    %92 = vector.broadcast %91 : vector<1x16xf32> to vector<16x16xf32>
    %93 = arith.addf %90, %92 : vector<16x16xf32>
    %c0_38 = arith.constant 0 : index
    %c0_39 = arith.constant 0 : index
    %94 = vector.load %arg11[%c0_38, %c0_39] : memref<16x32xf32, #tpu.memory_space<vmem>>, vector<16x32xf32>
    %cst_40 = arith.constant dense<0.000000e+00> : vector<16x32xf32>
    %95 = tpu.matmul %93, %94, %cst_40 {dimension_numbers = #tpu.dot_dimension_numbers<[1], [0], [0], [1], [0, 0, 1, 1], [], []>} : vector<16x16xf32>, vector<16x32xf32>, vector<16x32xf32> -> vector<16x32xf32>
    %c0_41 = arith.constant 0 : index
    %c0_42 = arith.constant 0 : index
    %96 = vector.load %arg12[%c0_41, %c0_42] : memref<1x32xf32, #tpu.memory_space<vmem>>, vector<1x32xf32>
    %97 = vector.broadcast %96 : vector<1x32xf32> to vector<16x32xf32>
    %98 = arith.addf %95, %97 : vector<16x32xf32>
    %c0_43 = arith.constant 0 : index
    %c0_44 = arith.constant 0 : index
    %99 = vector.load %arg13[%c0_43, %c0_44] : memref<32x4xf32, #tpu.memory_space<vmem>>, vector<32x4xf32>
    %cst_45 = arith.constant dense<0.000000e+00> : vector<16x4xf32>
    %100 = tpu.matmul %1, %99, %cst_45 {dimension_numbers = #tpu.dot_dimension_numbers<[1], [0], [0], [1], [0, 0, 1, 1], [], []>} : vector<16x32xf32>, vector<32x4xf32>, vector<16x4xf32> -> vector<16x4xf32>
    %c0_46 = arith.constant 0 : index
    %c0_47 = arith.constant 0 : index
    %101 = vector.load %arg14[%c0_46, %c0_47] : memref<32x4xf32, #tpu.memory_space<vmem>>, vector<32x4xf32>
    %cst_48 = arith.constant dense<0.000000e+00> : vector<16x4xf32>
    %102 = tpu.matmul %98, %101, %cst_48 {dimension_numbers = #tpu.dot_dimension_numbers<[1], [0], [0], [1], [0, 0, 1, 1], [], []>} : vector<16x32xf32>, vector<32x4xf32>, vector<16x4xf32> -> vector<16x4xf32>
    %103 = arith.addf %100, %102 : vector<16x4xf32>
    %c0_49 = arith.constant 0 : index
    %c0_50 = arith.constant 0 : index
    %104 = vector.load %arg15[%c0_49, %c0_50] : memref<1x4xf32, #tpu.memory_space<vmem>>, vector<1x4xf32>
    %105 = vector.broadcast %104 : vector<1x4xf32> to vector<16x4xf32>
    %106 = arith.addf %103, %105 : vector<16x4xf32>
    %107 = vector.shape_cast %106 : vector<16x4xf32> to vector<2x8x4xf32>
    %c0_51 = arith.constant 0 : index
    %c0_52 = arith.constant 0 : index
    %c0_53 = arith.constant 0 : index
    %108 = vector.load %arg16[%c0_51, %c0_52, %c0_53] : memref<2x8x4xf32, #tpu.memory_space<vmem>>, vector<2x8x4xf32>
    tpu.vector_store %arg16[%c0_51, %c0_52, %c0_53], %107 {strides = array<i32>} : memref<2x8x4xf32, #tpu.memory_space<vmem>>, vector<2x8x4xf32>,
    return
  }
  func.func @transform_0(%arg0: i32) -> (i32, i32, i32) {
    %c0_i32 = arith.constant 0 : i32
    %c0_i32_0 = arith.constant 0 : i32
    %c0_i32_1 = arith.constant 0 : i32
    return %arg0, %c0_i32, %c0_i32_0 : i32, i32, i32
  }
  func.func @transform_1(%arg0: i32) -> (i32, i32, i32) {
    %c0_i32 = arith.constant 0 : i32
    %c0_i32_0 = arith.constant 0 : i32
    %c0_i32_1 = arith.constant 0 : i32
    return %arg0, %c0_i32, %c0_i32_0 : i32, i32, i32
  }
  func.func @transform_2(%arg0: i32) -> (i32, i32) {
    %c0_i32 = arith.constant 0 : i32
    %c0_i32_0 = arith.constant 0 : i32
    %c0_i32_1 = arith.constant 0 : i32
    return %c0_i32, %c0_i32_0 : i32, i32
  }
  func.func @transform_3(%arg0: i32) -> (i32, i32) {
    %c0_i32 = arith.constant 0 : i32
    %c0_i32_0 = arith.constant 0 : i32
    %c0_i32_1 = arith.constant 0 : i32
    return %c0_i32, %c0_i32_0 : i32, i32
  }
  func.func @transform_4(%arg0: i32) -> (i32, i32) {
    %c0_i32 = arith.constant 0 : i32
    %c0_i32_0 = arith.constant 0 : i32
    %c0_i32_1 = arith.constant 0 : i32
    return %c0_i32, %c0_i32_0 : i32, i32
  }
  func.func @transform_5(%arg0: i32) -> (i32, i32) {
    %c0_i32 = arith.constant 0 : i32
    %c0_i32_0 = arith.constant 0 : i32
    %c0_i32_1 = arith.constant 0 : i32
    return %c0_i32, %c0_i32_0 : i32, i32
  }
  func.func @transform_6(%arg0: i32) -> (i32, i32) {
    %c0_i32 = arith.constant 0 : i32
    %c0_i32_0 = arith.constant 0 : i32
    %c0_i32_1 = arith.constant 0 : i32
    return %c0_i32, %c0_i32_0 : i32, i32
  }
  func.func @transform_7(%arg0: i32) -> (i32, i32) {
    %c0_i32 = arith.constant 0 : i32
    %c0_i32_0 = arith.constant 0 : i32
    %c0_i32_1 = arith.constant 0 : i32
    return %c0_i32, %c0_i32_0 : i32, i32
  }
  func.func @transform_8(%arg0: i32) -> (i32, i32) {
    %c0_i32 = arith.constant 0 : i32
    %c0_i32_0 = arith.constant 0 : i32
    %c0_i32_1 = arith.constant 0 : i32
    return %c0_i32, %c0_i32_0 : i32, i32
  }
  func.func @transform_9(%arg0: i32) -> (i32, i32) {
    %c0_i32 = arith.constant 0 : i32
    %c0_i32_0 = arith.constant 0 : i32
    %c0_i32_1 = arith.constant 0 : i32
    return %c0_i32, %c0_i32_0 : i32, i32
  }
  func.func @transform_10(%arg0: i32) -> (i32, i32) {
    %c0_i32 = arith.constant 0 : i32
    %c0_i32_0 = arith.constant 0 : i32
    %c0_i32_1 = arith.constant 0 : i32
    return %c0_i32, %c0_i32_0 : i32, i32
  }
  func.func @transform_11(%arg0: i32) -> (i32, i32) {
    %c0_i32 = arith.constant 0 : i32
    %c0_i32_0 = arith.constant 0 : i32
    %c0_i32_1 = arith.constant 0 : i32
    return %c0_i32, %c0_i32_0 : i32, i32
  }
  func.func @transform_12(%arg0: i32) -> (i32, i32) {
    %c0_i32 = arith.constant 0 : i32
    %c0_i32_0 = arith.constant 0 : i32
    %c0_i32_1 = arith.constant 0 : i32
    return %c0_i32, %c0_i32_0 : i32, i32
  }
  func.func @transform_13(%arg0: i32) -> (i32, i32) {
    %c0_i32 = arith.constant 0 : i32
    %c0_i32_0 = arith.constant 0 : i32
    %c0_i32_1 = arith.constant 0 : i32
    return %c0_i32, %c0_i32_0 : i32, i32
  }
  func.func @transform_14(%arg0: i32) -> (i32, i32) {
    %c0_i32 = arith.constant 0 : i32
    %c0_i32_0 = arith.constant 0 : i32
    %c0_i32_1 = arith.constant 0 : i32
    return %c0_i32, %c0_i32_0 : i32, i32
  }
  func.func @transform_15(%arg0: i32) -> (i32, i32, i32) {
    %c0_i32 = arith.constant 0 : i32
    %c0_i32_0 = arith.constant 0 : i32
    %c0_i32_1 = arith.constant 0 : i32
    return %arg0, %c0_i32, %c0_i32_0 : i32, i32, i32
  }
}

</mosaic_0001>

<bundles_post_ra>
// kernel: tpu_custom_call.1
= control target key start
LH: loop header
LB: loop body
LE: loop exit
PB: predicated region body
PF: predicated region fallthrough
CT: control target
= control target key end

     0   :  { %v688_v0 = vmov 0   ;;  %vm82_vm0 = vcmask 130048   ;;  %s691_s30 = smov 120   ;;  %vm119_vm1 = vcmask 64512   ;;  %s693_s16 = smov 88   ;;  %vm549_vm9 = vcmask 261120   ;;  %s913_s1 = inlined_call_operand.vmem [shape: f32[2,8,1], index: 1, kind: input, shape index: {}]   ;;  %s914_s2 = inlined_call_operand.vmem [shape: f32[1,16], index: 2, kind: input, shape index: {}]   ;;  %s915_s3 = inlined_call_operand.vmem [shape: f32[1,16], index: 3, kind: input, shape index: {}]   ;;  %s916_s5 = inlined_call_operand.vmem [shape: f32[1,48], index: 5, kind: input, shape index: {}]   ;;  %s917_s4 = inlined_call_operand.vmem [shape: f32[16,48], index: 4, kind: input, shape index: {}]   ;;  %s918_s6 = inlined_call_operand.vmem [shape: f32[16,16], index: 6, kind: input, shape index: {}]   ;;  %s919_s7 = inlined_call_operand.vmem [shape: f32[1,16], index: 7, kind: input, shape index: {}]   ;;  %s920_s8 = inlined_call_operand.vmem [shape: f32[1,16], index: 8, kind: input, shape index: {}]   ;;  %s921_s9 = inlined_call_operand.vmem [shape: f32[1,16], index: 9, kind: input, shape index: {}]   ;;  %s922_s11 = inlined_call_operand.vmem [shape: f32[1,32], index: 11, kind: input, shape index: {}]   ;;  %s923_s10 = inlined_call_operand.vmem [shape: f32[16,32], index: 10, kind: input, shape index: {}]   ;;  %s924_s12 = inlined_call_operand.vmem [shape: f32[32,4], index: 12, kind: input, shape index: {}]   ;;  %s925_s13 = inlined_call_operand.vmem [shape: f32[32,4], index: 13, kind: input, shape index: {}]   ;;  %s926_s0 = inlined_call_operand.vmem [shape: f32[2,8,32], index: 0, kind: input, shape index: {}]   ;;  %s927_s14 = inlined_call_operand.vmem [shape: f32[1,4], index: 14, kind: input, shape index: {}]   ;;  %s928_s15 = inlined_call_operand.vmem [shape: f32[2,8,4], index: 15, kind: output, shape index: {}]  }
   0x1   :  { %652 = vset.pattern.permute.xlu0 %v688_v0  ;;  %v52_v1 = vld [vmem:[%s913_s1] sm:$0xff]  ;;  %v53_v2 = vld [vmem:[%s913_s1 + $0x8] sm:$0xff]  ;;  %vm614_vm10 = vcmask 31744  }
   0x2   :  { %57 = vperm.xlu0 %652, %v52_v1   ;;  %v77_v3 = vld [vmem:[%s917_s4 + $0x8] sm:$0xff]  ;;  %v76_v4 = vld [vmem:[%s917_s4] sm:$0xff]  ;;  %s690_s4 = smov 112  }
   0x3   :  { %103 = vmatpush.msra.mxu0 %v77_v3  ;;  %v658_v5 = vld [vmem:[%s914_s2] ss:$0 sm:$0xff] }
   0x4   :  { %v659_v6 = vld [vmem:[%s915_s3] ss:$0 sm:$0xff]  ;;  %s689_s3 = smov 104  }
   0x5   :  { %104 = vmatpush.msra.mxu0 %v76_v4  ;;  %v660_v13 = vld [vmem:[%s916_s5] ss:$0 sm:$0xff]  ;;  %s692_s5 = smov 96  }
   0xa   :  { %62 = vperm.xlu0 %652, %v53_v2  }
  0x74   :  { %v793_v7 = vpop.permute.xlu0 %57 }
  0x75   :  { %v68_v8 = vmul.f32 %v658_v5, %v793_v7 }
  0x77   :  { %v74_v9 = vadd.f32 %v659_v6, %v68_v8 }
  0x79   :  { %621 = vmatmul.msk.f32.vlgmr.msra.gmra.mxu0 %vm82_vm0, %v74_v9  ;;  %v114_v9 = vld [vmem:[%s918_s6] sm:$0xff] }
  0x7c   :  { %v797_v10 = vpop.permute.xlu0 %62 }
  0x7d   :  { %v69_v11 = vmul.f32 %v658_v5, %v797_v10 }
  0x7f   :  { %v75_v12 = vadd.f32 %v659_v6, %v69_v11  ;;  %v115_v11 = vld [vmem:[%s918_s6 + $0x8] sm:$0xff] }
  0x81   :  { %622 = vmatmul.msk.f32.gmra.mxu0 %vm82_vm0, %v75_v12 }
  0xf6   :  { %v106_v14 = vpop.f32.mrf.mxu0 }
  0xf7   :  { %v804_v15 = vadd.f32 %v660_v13, %v106_v14 }
  0xf9   :  { %249 = vrot.lane.b32.xlu2 %v804_v15, %s689_s3  ;;  %117 = vrot.lane.b32.xlu1 %v804_v15, %s690_s4  ;;  %v112_v18 = vmul.f32 0.35355338, %v804_v15 }
  0xfe   :  { %v109_v16 = vpop.f32.mrf.mxu0 }
  0xff   :  { %v808_v17 = vadd.f32 %v660_v13, %v109_v16 }
 0x101   :  { %247 = vrot.lane.b32.xlu2 %v112_v18, %s691_s30  ;;  %277 = vrot.lane.b32.xlu0 %v808_v17, %s689_s3  ;;  %v113_v19 = vmul.f32 0.35355338, %v808_v17  ;;  %v653_v29 = vpack.i.bf16 %v808_v17, %v804_v15 }
 0x102   :  { %146 = vrot.lane.b32.xlu1 %v808_v17, %s690_s4 }
 0x10a   :  { %275 = vrot.lane.b32.xlu1 %v113_v19, %s691_s30 }
 0x153   :  { %v250_v20 = vpop.permute.xlu2 %249 }
 0x154   :  { %629 = vmatpush.xpose.msk.msra.mxu1 %vm119_vm1, %v250_v20 }
 0x158   :  { %398 = vmatpush.msrb.mxu1 %v115_v11 }
 0x15b   :  { %v248_v21 = vpop.permute.xlu2 %247 }
 0x15c   :  { %630 = vmatmul.msk.f32.vlgmr.msra.gmra.mxu1 %vm119_vm1, %v248_v21 }
 0x16b   :  { %v118_v22 = vpop.permute.xlu1 %117 }
 0x16c   :  { %623 = vmatpush.xpose.msk.msra.mxu2 %vm119_vm1, %v118_v22 }
 0x16f   :  { %624 = vmatmul.msk.f32.vlgmr.msra.gmra.mxu2 %vm119_vm1, %v112_v18 }
 0x173   :  { %v278_v23 = vpop.permute.xlu0 %277 }
 0x174   :  { %v147_v24 = vpop.permute.xlu1 %146 }
 0x175   :  { %625 = vmatpush.xpose.msk.msrb.mxu2 %vm119_vm1, %v147_v24 }
 0x178   :  { %626 = vmatmul.msk.f32.vlgmr.msrb.gmra.mxu2 %vm119_vm1, %v113_v19 }
 0x179   :  { %631 = vmatpush.xpose.msk.msra.mxu2 %vm119_vm1, %v278_v23 }
 0x17c   :  { %v276_v25 = vpop.permute.xlu1 %275 }
 0x17d   :  { %427 = vmatpush.msrb.mxu2 %v114_v9 }
 0x180   :  { %632 = vmatmul.msk.f32.vlgmr.msra.gmra.mxu2 %vm119_vm1, %v276_v25 }
 0x1d9   :  { %v272_v26 = vpop.f32.mrf.mxu1 }
 0x1da   :  { %v303_v27 = vsel %vm119_vm1, %v272_v26, -inf }
 0x1db   :  { %304 = vmax.xlane.f32.xlu1 %v303_v27 }
 0x1f2   :  { %v142_v28 = vpop.f32.mrf.mxu2 }
 0x1f3   :  { %v173_v30 = vsel %vm119_vm1, %v142_v28, -inf }
 0x1f4   :  { %174 = vmax.xlane.f32.xlu2 %v173_v30  ;;  %654 = vrot.lane.b32.xlu1 %v653_v29, %s692_s5  ;;  %v694_v29 = vmov 16.0  }
 0x1fb   :  { %v170_v31 = vpop.f32.mrf.mxu2 }
 0x1fc   :  { %v176_v32 = vsel %vm119_vm1, %v170_v31, -inf }
 0x1fd   :  { %177 = vmax.xlane.f32.xlu0 %v176_v32 }
 0x203   :  { %v300_v33 = vpop.f32.mrf.mxu2 }
 0x204   :  { %v306_v34 = vsel %vm119_vm1, %v300_v33, -inf }
 0x205   :  { %307 = vmax.xlane.f32.xlu2 %v306_v34 }
 0x24e   :  { %v305_v35 = vpop.xlane.xlu1 %304 }
 0x24f   :  { %v309_v36 = vsub.f32 %v272_v26, %v305_v35 }
 0x251   :  { %v311_v37 = vmul.f32 1.442695, %v309_v36 }
 0x253   :  { %666 = vpow2.f32 %v311_v37 }
 0x259   :  { %v667_v38 = vpop.eup %666 }
 0x25a   :  { %v315_v39 = vsel %vm119_vm1, %v667_v38, 0.0 }
 0x25b   :  { %316 = vadd.xlane.f32.xlu2 %v315_v39 }
 0x266   :  { %v655_v40 = vpop.permute.xlu1 %654 }
 0x267   :  { %v175_v41 = vpop.xlane.xlu2 %174  ;;  %v656_v42 = vunpack.i.l.bf16 %v655_v40  ;;  %v657_v43 = vunpack.i.h.bf16 %v655_v40 }
 0x268   :  { %v179_v44 = vsub.f32 %v142_v28, %v175_v41 }
 0x269   :  { %216 = vmatpush.msra.mxu3 %v656_v42 }
 0x26a   :  { %v181_v45 = vmul.f32 1.442695, %v179_v44  ;;  %v507_v44 = vld [vmem:[%s923_s10 + $0x8] sm:$0xff] }
 0x26b   :  { %242 = vmatpush.msrb.mxu3 %v657_v43 }
 0x26c   :  { %668 = vpow2.f32 %v181_v45  ;;  %v506_v45 = vld [vmem:[%s923_s10] sm:$0xff] }
 0x270   :  { %v178_v46 = vpop.xlane.xlu0 %177 }
 0x271   :  { %v180_v47 = vsub.f32 %v170_v31, %v178_v46 }
 0x272   :  { %v669_v48 = vpop.eup %668 }
 0x273   :  { %v183_v49 = vmul.f32 1.442695, %v180_v47  ;;  %v185_v50 = vsel %vm119_vm1, %v669_v48, 0.0 }
 0x274   :  { %186 = vadd.xlane.f32.xlu2 %v185_v50  ;;  %v548_v50 = vld [vmem:[%s925_s13 + $0x18] sm:$0xff] }
 0x275   :  { %670 = vpow2.f32 %v183_v49  ;;  %v544_v49 = vld [vmem:[%s924_s12 + $0x18] sm:$0xff] }
 0x276   :  { %597 = vmatpush.msra.mxu1 %v544_v49 }
 0x278   :  { %v308_v51 = vpop.xlane.xlu2 %307 }
 0x279   :  { %v310_v52 = vsub.f32 %v300_v33, %v308_v51  ;;  %v547_v51 = vld [vmem:[%s925_s13 + $0x10] sm:$0xff] }
 0x27b   :  { %v671_v53 = vpop.eup %670  ;;  %v313_v54 = vmul.f32 1.442695, %v310_v52  ;;  %v543_v52 = vld [vmem:[%s924_s12 + $0x10] sm:$0xff] }
 0x27c   :  { %v188_v55 = vsel %vm119_vm1, %v671_v53, 0.0  ;;  %598 = vmatpush.msra.mxu1 %v543_v52 }
 0x27d   :  { %672 = vpow2.f32 %v313_v54  ;;  %189 = vadd.xlane.f32.xlu0 %v188_v55 }
 0x283   :  { %v673_v56 = vpop.eup %672 }
 0x284   :  { %v318_v57 = vsel %vm119_vm1, %v673_v56, 0.0 }
 0x285   :  { %319 = vadd.xlane.f32.xlu2 %v318_v57 }
 0x291   :  { %325 = vrot.lane.b32.xlu0 %v804_v15, %s693_s16 }
 0x29d   :  { %351 = vrot.lane.b32.xlu2 %v808_v17, %s693_s16  ;;  %v661_v17 = vld [vmem:[%s919_s7] ss:$0 sm:$0xff] }
 0x2ce   :  { %v317_v58 = vpop.xlane.xlu2 %316 }
 0x2e7   :  { %v187_v59 = vpop.xlane.xlu2 %186 }
 0x2e8   :  { %674 = vrcp.f32 %v187_v59 }
 0x2ee   :  { %v675_v60 = vpop.eup %674 }
 0x2ef   :  { %v193_v61 = vmul.f32 %v675_v60, %v669_v48 }
 0x2f0   :  { %v190_v62 = vpop.xlane.xlu0 %189 }
 0x2f1   :  { %676 = vrcp.f32 %v190_v62  ;;  %627 = vmatmul.msk.f32.vlgmr.msra.gmra.mxu3 %vm119_vm1, %v193_v61 }
 0x2f7   :  { %v677_v63 = vpop.eup %676 }
 0x2f8   :  { %v320_v0 = vpop.xlane.xlu2 %319  ;;  %v194_v1 = vmul.f32 %v677_v63, %v671_v53 }
 0x2f9   :  { %678 = vrcp.f32 %v320_v0  ;;  %v662_v0 = vld [vmem:[%s920_s8] ss:$0 sm:$0xff] }
 0x2fa   :  { %680 = vrcp.f32 %v317_v58  ;;  %628 = vmatmul.msk.f32.vlgmr.msrb.gmra.mxu3 %vm119_vm1, %v194_v1 }
 0x2fb   :  { %682 = vrcp.f32 %v694_v29 }
 0x2ff   :  { %v679_v2 = vpop.eup %678 }
 0x300   :  { %v681_v3 = vpop.eup %680  ;;  %v352_v4 = vpop.permute.xlu2 %351  ;;  %v324_v5 = vmul.f32 %v679_v2, %v673_v56 }
 0x301   :  { %372 = vmatpush.msrb.mxu0 %v352_v4  ;;  %v323_v6 = vmul.f32 %v681_v3, %v667_v38  ;;  %v683_v30 = vpop.eup %682  ;;  %v663_v4 = vld [vmem:[%s921_s9] ss:$0 sm:$0xff] }
 0x302   :  { %634 = vmatmul.msk.f32.vlgmr.msrb.gmra.mxu0 %vm119_vm1, %v324_v5  ;;  %v450_v31 = vmul.f32 16.0, %v683_v30  ;;  %vm454_vm2 = vweird.f32 %v683_v30 }
 0x303   :  { %v326_v8 = vpop.permute.xlu0 %325  ;;  %568 = vmatpush.msra.mxu0 %v548_v50 }
 0x304   :  { %346 = vmatpush.msra.mxu3 %v326_v8  ;;  %v451_v32 = vsub.f32 1.0, %v450_v31 }
 0x305   :  { %633 = vmatmul.msk.f32.vlgmr.msra.gmra.mxu3 %vm119_vm1, %v323_v6  ;;  %569 = vmatpush.msra.mxu0 %v547_v51 }
 0x306   :  { %v452_v33 = vmul.f32 %v683_v30, %v451_v32  ;;  %532 = vmatpush.msrb.mxu3 %v507_v44 }
 0x308   :  { %v453_v34 = vadd.f32 %v683_v30, %v452_v33  ;;  %533 = vmatpush.msrb.mxu3 %v506_v45 }
 0x374   :  { %v218_v12 = vpop.f32.mrf.mxu3 }
 0x375   :  { %637 = vmatmul.msk.f32.vlgmr.msrb.gmra.mxu2 %vm119_vm1, %v218_v12 }
 0x37d   :  { %v244_v13 = vpop.f32.mrf.mxu3 }
 0x37e   :  { %638 = vmatmul.msk.f32.gmra.mxu2 %vm119_vm1, %v244_v13 }
 0x37f   :  { %v374_v15 = vpop.f32.mrf.mxu0 }
 0x388   :  { %v348_v14 = vpop.f32.mrf.mxu3 }
 0x389   :  { %635 = vmatmul.msk.f32.vlgmr.msrb.gmra.mxu1 %vm119_vm1, %v348_v14 }
 0x391   :  { %636 = vmatmul.msk.f32.gmra.mxu1 %vm119_vm1, %v374_v15 }
 0x3f8   :  { %v429_v16 = vpop.f32.mrf.mxu2 }
 0x401   :  { %v432_v23 = vpop.f32.mrf.mxu2 }
 0x406   :  { %v400_v18 = vpop.f32.mrf.mxu1 }
 0x407   :  { %v430_v19 = vadd.f32 %v429_v16, %v400_v18  ;;  %v546_v16 = vld [vmem:[%s925_s13 + $0x8] sm:$0xff]  ;;  %v545_v18 = vld [vmem:[%s925_s13] sm:$0xff] }
 0x408   :  { %570 = vmatpush.msra.mxu0 %v546_v16 }
 0x409   :  { %v439_v20 = vadd.f32 %v661_v17, %v430_v19  ;;  %v541_v19 = vld [vmem:[%s924_s12] sm:$0xff] }
 0x40a   :  { %571 = vmatpush.msra.mxu0 %v545_v18 }
 0x40b   :  { %v441_v21 = vadd.f32 %v439_v20, %v793_v7  ;;  %v455_v7 = vsel %vm454_vm2, %v683_v30, %v453_v34  ;;  %v50_v20 = vld [vmem:[%s926_s0] sm:$0xff] }
 0x40d   :  { %v443_v22 = vsel %vm82_vm0, %v441_v21, 0.0 }
 0x40e   :  { %444 = vadd.xlane.f32.xlu1 %v443_v22  ;;  %v403_v24 = vpop.f32.mrf.mxu1  ;;  %v664_v22 = vld [vmem:[%s922_s11] ss:$0 sm:$0xff] }
 0x40f   :  { %v433_v25 = vadd.f32 %v432_v23, %v403_v24 }
 0x411   :  { %v440_v26 = vadd.f32 %v661_v17, %v433_v25  ;;  %v542_v17 = vld [vmem:[%s924_s12 + $0x8] sm:$0xff] }
 0x412   :  { %599 = vmatpush.msra.mxu1 %v542_v17 }
 0x413   :  { %v442_v27 = vadd.f32 %v440_v26, %v797_v10 }
 0x414   :  { %600 = vmatpush.msra.mxu1 %v541_v19 }
 0x415   :  { %v446_v28 = vsel %vm82_vm0, %v442_v27, 0.0  ;;  %643 = vmatmul.msk.f32.vlgmr.msra.gmra.mxu1 %vm549_vm9, %v50_v20 }
 0x416   :  { %447 = vadd.xlane.f32.xlu0 %v446_v28  ;;  %v665_v28 = vld [vmem:[%s927_s14] ss:$0 sm:$0xff] }
 0x481   :  { %v445_v35 = vpop.xlane.xlu1 %444 }
 0x482   :  { %v456_v36 = vmul.f32 %v455_v7, %v445_v35 }
 0x484   :  { %v458_v37 = vsub.f32 %v441_v21, %v456_v36  ;;  %v51_v21 = vld [vmem:[%s926_s0 + $0x8] sm:$0xff] }
 0x485   :  { %644 = vmatmul.msk.f32.gmra.mxu1 %vm549_vm9, %v51_v21 }
 0x486   :  { %v460_v38 = vmul.f32 %v458_v37, %v458_v37 }
 0x488   :  { %v462_v39 = vsel %vm82_vm0, %v460_v38, 0.0 }
 0x489   :  { %463 = vadd.xlane.f32.xlu2 %v462_v39  ;;  %v448_v10 = vpop.xlane.xlu0 %447 }
 0x48a   :  { %v457_v40 = vmul.f32 %v455_v7, %v448_v10 }
 0x48c   :  { %v459_v41 = vsub.f32 %v442_v27, %v457_v40 }
 0x48e   :  { %v461_v42 = vmul.f32 %v459_v41, %v459_v41 }
 0x490   :  { %v465_v43 = vsel %vm82_vm0, %v461_v42, 0.0 }
 0x491   :  { %466 = vadd.xlane.f32.xlu1 %v465_v43 }
 0x492   :  { %v602_v27 = vpop.f32.mrf.mxu1 }
 0x4fc   :  { %v464_v46 = vpop.xlane.xlu2 %463 }
 0x4fd   :  { %v468_v47 = vmul.f32 %v464_v46, %v455_v7 }
 0x4ff   :  { %v470_v48 = vadd.f32 1e-05, %v468_v47 }
 0x501   :  { %684 = vrsqrt.f32 %v470_v48  ;;  %vm478_vm4 = vweird.f32 %v470_v48 }
 0x502   :  { %v605_v32 = vpop.f32.mrf.mxu1 }
 0x504   :  { %v467_v53 = vpop.xlane.xlu1 %466 }
 0x505   :  { %v469_v54 = vmul.f32 %v467_v53, %v455_v7 }
 0x507   :  { %v685_v55 = vpop.eup %684  ;;  %v471_v56 = vadd.f32 1e-05, %v469_v54 }
 0x508   :  { %v473_v57 = vmul.f32 %v685_v55, %v470_v48  ;;  %vm479_vm3 = vweird.f32 %v685_v55 }
 0x509   :  { %686 = vrsqrt.f32 %v471_v56  ;;  %vm480_vm5 = vmor %vm478_vm4, %vm479_vm3  ;;  %vm488_vm7 = vweird.f32 %v471_v56 }
 0x50a   :  { %v474_v58 = vmul.f32 %v685_v55, %v473_v57 }
 0x50c   :  { %v475_v59 = vmul.f32 0.5, %v474_v58 }
 0x50e   :  { %v476_v60 = vsub.f32 1.5, %v475_v59 }
 0x50f   :  { %v687_v61 = vpop.eup %686 }
 0x510   :  { %v477_v62 = vmul.f32 %v685_v55, %v476_v60  ;;  %v483_v63 = vmul.f32 %v687_v61, %v471_v56  ;;  %vm489_vm6 = vweird.f32 %v687_v61 }
 0x511   :  { %vm490_vm8 = vmor %vm488_vm7, %vm489_vm6 }
 0x512   :  { %v481_v1 = vsel %vm480_vm5, %v685_v55, %v477_v62  ;;  %v484_v2 = vmul.f32 %v687_v61, %v483_v63 }
 0x513   :  { %v492_v3 = vmul.f32 %v481_v1, %v458_v37 }
 0x514   :  { %v485_v5 = vmul.f32 0.5, %v484_v2 }
 0x515   :  { %v498_v6 = vmul.f32 %v662_v0, %v492_v3 }
 0x516   :  { %v486_v8 = vsub.f32 1.5, %v485_v5 }
 0x517   :  { %v504_v9 = vadd.f32 %v663_v4, %v498_v6 }
 0x518   :  { %v487_v11 = vmul.f32 %v687_v61, %v486_v8 }
 0x519   :  { %639 = vmatmul.msk.f32.vlgmr.msrb.gmra.mxu3 %vm82_vm0, %v504_v9 }
 0x51a   :  { %v491_v12 = vsel %vm490_vm8, %v687_v61, %v487_v11 }
 0x51b   :  { %v493_v13 = vmul.f32 %v491_v12, %v459_v41 }
 0x51d   :  { %v499_v14 = vmul.f32 %v662_v0, %v493_v13 }
 0x51f   :  { %v505_v15 = vadd.f32 %v663_v4, %v499_v14 }
 0x521   :  { %640 = vmatmul.msk.f32.gmra.mxu3 %vm82_vm0, %v505_v15 }
 0x59c   :  { %v535_v23 = vpop.f32.mrf.mxu3 }
 0x59d   :  { %v536_v24 = vadd.f32 %v664_v22, %v535_v23 }
 0x59f   :  { %641 = vmatmul.msk.f32.vlgmr.msra.gmra.mxu0 %vm549_vm9, %v536_v24 }
 0x5a4   :  { %v538_v25 = vpop.f32.mrf.mxu3 }
 0x5a5   :  { %v539_v26 = vadd.f32 %v664_v22, %v538_v25 }
 0x5a7   :  { %642 = vmatmul.msk.f32.gmra.mxu0 %vm549_vm9, %v539_v26 }
 0x61c   :  { %v573_v29 = vpop.f32.mrf.mxu0 }
 0x61d   :  { %v603_v30 = vadd.f32 %v602_v27, %v573_v29 }
 0x61f   :  { %v612_v31 = vadd.f32 %v665_v28, %v603_v30 }
 0x621   :  { %615 = vst.msk [vmem:[%s928_s15] sm:$0xff] %vm614_vm10, %v612_v31 }
 0x624   :  { %v576_v33 = vpop.f32.mrf.mxu0 }
 0x625   :  { %v606_v34 = vadd.f32 %v605_v32, %v576_v33 }
 0x627   :  { %v613_v7 = vadd.f32 %v665_v28, %v606_v34 }
 0x629   :  { %616 = vst.msk [vmem:[%s928_s15 + $0x8] sm:$0xff] %vm614_vm10, %v613_v7 }

</bundles_post_ra>
